<compile_context>
chip_gen: v5e
topology: v5e:2x2
jax: 0.10.0
libtpu: 0.0.40
codegen_flags: <defaults>
</compile_context>

<pallas_src>
import jax
import jax.numpy as jnp
from jax import lax
from jax.experimental import pallas as pl
from jax.experimental.pallas import tpu as pltpu

LANE = 128  # lane width; hidden head dims (100 / 10) are zero-padded to this


def _head_kernel(x1_ref, x2_ref,
                 w1a_ref, w1b_ref, w2_ref, w3r_ref, bias_ref,
                 o_ref):
    # Layer 1: split-K dots replace concat([x1, x2], 1) @ W1 (no (B,2048) copy).
    # f32 -> bf16 cast happens here (VPU), not in a separate XLA pass over HBM.
    x1 = x1_ref[...].astype(jnp.bfloat16)
    x2 = x2_ref[...].astype(jnp.bfloat16)
    h = jnp.dot(x1, w1a_ref[...], preferred_element_type=jnp.float32)
    h = h + jnp.dot(x2, w1b_ref[...], preferred_element_type=jnp.float32)
    h = jnp.maximum(h + bias_ref[0:1, :], 0.0)                 # (TB, 128) f32

    # Layer 2 (out-dim padded to 128 lanes; padded columns stay exactly zero).
    h = jnp.dot(h.astype(jnp.bfloat16), w2_ref[...],
                preferred_element_type=jnp.float32)
    h = jnp.maximum(h + bias_ref[1:2, :], 0.0)                 # (TB, 128) f32

    # Layer 3: only column 0 is live.  Produce it lane-dense as a (1, TB) row:
    #   row = relu( w3[:, 0]^T @ h^T + b3 )   (dot_general contracting on 128,
    #   same trans_b pattern as q @ k.T -- no materialized transpose needed).
    row = lax.dot_general(w3r_ref[...], h,
                          dimension_numbers=(((1,), (1,)), ((), ())),
                          preferred_element_type=jnp.float32)  # (1, TB)
    row = jnp.maximum(row + bias_ref[2:3, 0:1], 0.0)
    o_ref[...] = row                                            # lane-dense store


def _round_up(n, m):
    return (n + m - 1) // m * m


def _pad2d(a, rows, cols):
    r, c = a.shape
    return jnp.pad(a, ((0, rows - r), (0, cols - c)))


def first_network_head(x1, x2, params):
    """x1, x2: (B, 1024) f32 pooler outputs. Returns (B, 1) f32."""
    w1, b1, w2, b2, w3, b3 = params          # w: (in, out), b: (1, out)
    B, H = x1.shape                          # H = 1024 per tower

    # ---- pack weights (small, one-time): split W1 at the concat boundary
    # (row H = 1024, (8,128)-tile aligned), zero-pad out-dims to 128 lanes.
    w1p = _pad2d(w1, 2 * H, LANE)
    w1a = w1p[:H].astype(jnp.bfloat16)       # consumes x1
    w1b = w1p[H:].astype(jnp.bfloat16)       # consumes x2
    w2p = _pad2d(w2, LANE, LANE).astype(jnp.bfloat16)
    w3r = _pad2d(w3.T, 1, LANE)              # (1, 128) f32, live cols [:10]
    bias = jnp.zeros((3, LANE), jnp.float32) # rows: b1, b2, b3(col 0)
    bias = bias.at[0, :b1.shape[1]].set(b1[0])
    bias = bias.at[1, :b2.shape[1]].set(b2[0])
    bias = bias.at[2, 0].set(b3[0, 0])

    # ---- batch tiling: no batch pad, no activation cast in the wrapper.
    # TB=1024 keeps double-buffered f32 x1+x2 (~32 MiB) + weights inside v7x's
    # 64 MiB per-TC VMEM; ensure >= 2 grid steps (v7x megacore) when B >= 16.
    TB = min(1024, _round_up(B, 8))
    if TB >= B and B >= 16:
        TB = _round_up(pl.cdiv(B, 2), 8)
    ntiles = pl.cdiv(B, TB)

    x_spec = pl.BlockSpec((TB, H), lambda i: (i, 0))
    resident = lambda a: pl.BlockSpec(a.shape, lambda i: (0,) * a.ndim)

    out = pl.pallas_call(
        _head_kernel,
        out_shape=jax.ShapeDtypeStruct((ntiles, TB), jnp.float32),
        grid=(ntiles,),
        in_specs=[x_spec, x_spec,
                  resident(w1a), resident(w1b),
                  resident(w2p), resident(w3r), resident(bias)],
        out_specs=pl.BlockSpec((1, TB), lambda i: (i, 0)),
        compiler_params=pltpu.CompilerParams(
            dimension_semantics=("parallel",),
            vmem_limit_bytes=48 * 1024 * 1024),
    )(x1, x2, w1a, w1b, w2p, w3r, bias)

    # Ragged last tile (and any non-live rows) are discarded here -- keep this
    # slice; the kernel does not zero dead rows.
    return out.reshape(ntiles * TB)[:B].reshape(B, 1)


def init_params(key):
    """Deterministic init matching nn.Linear shapes; W pre-transposed to
    (in, out) so the head computes x @ W + b directly."""
    def linear(k, fan_in, fan_out):
        kw, kb = jax.random.split(k)
        bound = 1.0 / jnp.sqrt(fan_in)
        w = jax.random.uniform(kw, (fan_in, fan_out), jnp.float32, -bound, bound)
        b = jax.random.uniform(kb, (1, fan_out), jnp.float32, -bound, bound)
        return w, b

    k1, k2, k3 = jax.random.split(key, 3)
    w1, b1 = linear(k1, 2048, 100)   # self.linear
    w2, b2 = linear(k2, 100, 10)     # self.linear2
    w3, b3 = linear(k3, 10, 1)       # self.linear3
    return (w1, b1, w2, b2, w3, b3)


def reference(x1, x2, params):
    w1, b1, w2, b2, w3, b3 = params
    z = jnp.concatenate([x1, x2], axis=1)
    h = jnp.maximum(z @ w1 + b1, 0.0)
    h = jnp.maximum(h @ w2 + b2, 0.0)
    h = jnp.maximum(h @ w3 + b3, 0.0)
    return h


if __name__ == "__main__":
    key = jax.random.PRNGKey(0)
    kx1, kx2, kp = jax.random.split(key, 3)

    B = 8  # small, sublane-aligned batch
    # Stand-ins for bert_model(...).pooler_output of each input (hidden=1024).
    x1 = jax.random.normal(kx1, (B, 1024), jnp.float32)
    x2 = jax.random.normal(kx2, (B, 1024), jnp.float32)
    params = init_params(kp)

    out = first_network_head(x1, x2, params)
    out = jax.block_until_ready(out)

    ref = reference(x1, x2, params)
    assert out.shape == (B, 1), out.shape
    # bf16 layer-1/2 inputs with f32 accumulation at K=2048 -> loosened tolerance.
    assert jnp.allclose(out, ref, atol=2e-2, rtol=2e-2), "mismatch vs reference"

    print("KERNEL_OK")
</pallas_src>

<mosaic_0001>
module attributes {stable_mosaic.version = 11 : i64} {
  func.func @_head_kernel(%arg0: i32, %arg1: memref<8x1024xf32, #tpu.memory_space<vmem>>, %arg2: memref<8x1024xf32, #tpu.memory_space<vmem>>, %arg3: memref<1024x128xbf16, #tpu.memory_space<vmem>>, %arg4: memref<1024x128xbf16, #tpu.memory_space<vmem>>, %arg5: memref<128x128xbf16, #tpu.memory_space<vmem>>, %arg6: memref<1x128xf32, #tpu.memory_space<vmem>>, %arg7: memref<3x128xf32, #tpu.memory_space<vmem>>, %arg8: memref<1x8xf32, #tpu.memory_space<vmem>>) attributes {dimension_semantics = [#tpu.dimension_semantics<parallel>], iteration_bounds = array<i64: 1>, scalar_prefetch = 0 : i64, scratch_operands = 0 : i64, tpu.core_type = #tpu.core_type<tc>, window_params = [{transform_indices = @transform_0, window_bounds = array<i64: 8, 1024>}, {transform_indices = @transform_1, window_bounds = array<i64: 8, 1024>}, {pipeline_mode = #tpu.pipeline_mode<synchronous>, transform_indices = @transform_2, window_bounds = array<i64: 1024, 128>}, {pipeline_mode = #tpu.pipeline_mode<synchronous>, transform_indices = @transform_3, window_bounds = array<i64: 1024, 128>}, {pipeline_mode = #tpu.pipeline_mode<synchronous>, transform_indices = @transform_4, window_bounds = array<i64: 128, 128>}, {pipeline_mode = #tpu.pipeline_mode<synchronous>, transform_indices = @transform_5, window_bounds = array<i64: 1, 128>}, {pipeline_mode = #tpu.pipeline_mode<synchronous>, transform_indices = @transform_6, window_bounds = array<i64: 3, 128>}, {transform_indices = @transform_7, window_bounds = array<i64: 1, 8>}]} {
    %c0 = arith.constant 0 : index
    %c0_0 = arith.constant 0 : index
    %0 = vector.load %arg1[%c0, %c0_0] : memref<8x1024xf32, #tpu.memory_space<vmem>>, vector<8x1024xf32>
    %1 = arith.truncf %0 : vector<8x1024xf32> to vector<8x1024xbf16>
    %c0_1 = arith.constant 0 : index
    %c0_2 = arith.constant 0 : index
    %2 = vector.load %arg2[%c0_1, %c0_2] : memref<8x1024xf32, #tpu.memory_space<vmem>>, vector<8x1024xf32>
    %3 = arith.truncf %2 : vector<8x1024xf32> to vector<8x1024xbf16>
    %c0_3 = arith.constant 0 : index
    %c0_4 = arith.constant 0 : index
    %4 = vector.load %arg3[%c0_3, %c0_4] : memref<1024x128xbf16, #tpu.memory_space<vmem>>, vector<1024x128xbf16>
    %cst = arith.constant dense<0.000000e+00> : vector<8x128xf32>
    %5 = tpu.matmul %1, %4, %cst {dimension_numbers = #tpu.dot_dimension_numbers<[1], [0], [0], [1], [0, 0, 1, 1], [], []>} : vector<8x1024xbf16>, vector<1024x128xbf16>, vector<8x128xf32> -> vector<8x128xf32>
    %c0_5 = arith.constant 0 : index
    %c0_6 = arith.constant 0 : index
    %6 = vector.load %arg4[%c0_5, %c0_6] : memref<1024x128xbf16, #tpu.memory_space<vmem>>, vector<1024x128xbf16>
    %cst_7 = arith.constant dense<0.000000e+00> : vector<8x128xf32>
    %7 = tpu.matmul %3, %6, %cst_7 {dimension_numbers = #tpu.dot_dimension_numbers<[1], [0], [0], [1], [0, 0, 1, 1], [], []>} : vector<8x1024xbf16>, vector<1024x128xbf16>, vector<8x128xf32> -> vector<8x128xf32>
    %8 = arith.addf %5, %7 : vector<8x128xf32>
    %c0_8 = arith.constant 0 : index
    %c0_9 = arith.constant 0 : index
    %9 = vector.load %arg7[%c0_8, %c0_9] : memref<3x128xf32, #tpu.memory_space<vmem>>, vector<1x128xf32>
    %10 = vector.broadcast %9 : vector<1x128xf32> to vector<8x128xf32>
    %11 = arith.addf %8, %10 : vector<8x128xf32>
    %cst_10 = arith.constant 0.000000e+00 : f32
    %12 = vector.broadcast %cst_10 : f32 to vector<8x128xf32>
    %13 = arith.maximumf %11, %12 : vector<8x128xf32>
    %14 = arith.truncf %13 : vector<8x128xf32> to vector<8x128xbf16>
    %c0_11 = arith.constant 0 : index
    %c0_12 = arith.constant 0 : index
    %15 = vector.load %arg5[%c0_11, %c0_12] : memref<128x128xbf16, #tpu.memory_space<vmem>>, vector<128x128xbf16>
    %cst_13 = arith.constant dense<0.000000e+00> : vector<8x128xf32>
    %16 = tpu.matmul %14, %15, %cst_13 {dimension_numbers = #tpu.dot_dimension_numbers<[1], [0], [0], [1], [0, 0, 1, 1], [], []>} : vector<8x128xbf16>, vector<128x128xbf16>, vector<8x128xf32> -> vector<8x128xf32>
    %c1 = arith.constant 1 : index
    %c0_14 = arith.constant 0 : index
    %17 = vector.load %arg7[%c1, %c0_14] : memref<3x128xf32, #tpu.memory_space<vmem>>, vector<1x128xf32>
    %18 = vector.broadcast %17 : vector<1x128xf32> to vector<8x128xf32>
    %19 = arith.addf %16, %18 : vector<8x128xf32>
    %cst_15 = arith.constant 0.000000e+00 : f32
    %20 = vector.broadcast %cst_15 : f32 to vector<8x128xf32>
    %21 = arith.maximumf %19, %20 : vector<8x128xf32>
    %c0_16 = arith.constant 0 : index
    %c0_17 = arith.constant 0 : index
    %22 = vector.load %arg6[%c0_16, %c0_17] : memref<1x128xf32, #tpu.memory_space<vmem>>, vector<1x128xf32>
    %cst_18 = arith.constant dense<0.000000e+00> : vector<1x8xf32>
    %23 = tpu.matmul %22, %21, %cst_18 {dimension_numbers = #tpu.dot_dimension_numbers<[1], [1], [0], [0], [0, 0, 1, 0], [], []>} : vector<1x128xf32>, vector<8x128xf32>, vector<1x8xf32> -> vector<1x8xf32>
    %c2 = arith.constant 2 : index
    %c0_19 = arith.constant 0 : index
    %24 = vector.load %arg7[%c2, %c0_19] : memref<3x128xf32, #tpu.memory_space<vmem>>, vector<1x1xf32>
    %25 = vector.broadcast %24 : vector<1x1xf32> to vector<1x8xf32>
    %26 = arith.addf %23, %25 : vector<1x8xf32>
    %cst_20 = arith.constant 0.000000e+00 : f32
    %27 = vector.broadcast %cst_20 : f32 to vector<1x8xf32>
    %28 = arith.maximumf %26, %27 : vector<1x8xf32>
    %c0_21 = arith.constant 0 : index
    %c0_22 = arith.constant 0 : index
    %29 = vector.load %arg8[%c0_21, %c0_22] : memref<1x8xf32, #tpu.memory_space<vmem>>, vector<1x8xf32>
    tpu.vector_store %arg8[%c0_21, %c0_22], %28 {strides = array<i32>} : memref<1x8xf32, #tpu.memory_space<vmem>>, vector<1x8xf32>,
    return
  }
  func.func @transform_0(%arg0: i32) -> (i32, i32) {
    %c0_i32 = arith.constant 0 : i32
    %c0_i32_0 = arith.constant 0 : i32
    return %arg0, %c0_i32 : i32, i32
  }
  func.func @transform_1(%arg0: i32) -> (i32, i32) {
    %c0_i32 = arith.constant 0 : i32
    %c0_i32_0 = arith.constant 0 : i32
    return %arg0, %c0_i32 : i32, i32
  }
  func.func @transform_2(%arg0: i32) -> (i32, i32) {
    %c0_i32 = arith.constant 0 : i32
    %c0_i32_0 = arith.constant 0 : i32
    %c0_i32_1 = arith.constant 0 : i32
    return %c0_i32, %c0_i32_0 : i32, i32
  }
  func.func @transform_3(%arg0: i32) -> (i32, i32) {
    %c0_i32 = arith.constant 0 : i32
    %c0_i32_0 = arith.constant 0 : i32
    %c0_i32_1 = arith.constant 0 : i32
    return %c0_i32, %c0_i32_0 : i32, i32
  }
  func.func @transform_4(%arg0: i32) -> (i32, i32) {
    %c0_i32 = arith.constant 0 : i32
    %c0_i32_0 = arith.constant 0 : i32
    %c0_i32_1 = arith.constant 0 : i32
    return %c0_i32, %c0_i32_0 : i32, i32
  }
  func.func @transform_5(%arg0: i32) -> (i32, i32) {
    %c0_i32 = arith.constant 0 : i32
    %c0_i32_0 = arith.constant 0 : i32
    %c0_i32_1 = arith.constant 0 : i32
    return %c0_i32, %c0_i32_0 : i32, i32
  }
  func.func @transform_6(%arg0: i32) -> (i32, i32) {
    %c0_i32 = arith.constant 0 : i32
    %c0_i32_0 = arith.constant 0 : i32
    %c0_i32_1 = arith.constant 0 : i32
    return %c0_i32, %c0_i32_0 : i32, i32
  }
  func.func @transform_7(%arg0: i32) -> (i32, i32) {
    %c0_i32 = arith.constant 0 : i32
    %c0_i32_0 = arith.constant 0 : i32
    return %arg0, %c0_i32 : i32, i32
  }
}

</mosaic_0001>

<bundles_post_ra>
// kernel: tpu_custom_call.1
= control target key start
LH: loop header
LB: loop body
LE: loop exit
PB: predicated region body
PF: predicated region fallthrough
CT: control target
= control target key end

     0   :  { %12 = vsyncpa [#allocation3], 0  ;;  %s2422_s0 = inlined_call_operand.hbm [shape: f32[8,1024], index: 0, kind: input, shape index: {}]   ;;  %s2423_s1 = inlined_call_operand.hbm [shape: f32[8,1024], index: 1, kind: input, shape index: {}]   ;;  %s2424_s2 = inlined_call_operand.hbm [shape: bf16[1024,128], index: 2, kind: input, shape index: {}]   ;;  %s2425_s3 = inlined_call_operand.hbm [shape: bf16[1024,128], index: 3, kind: input, shape index: {}]   ;;  %s2426_s4 = inlined_call_operand.hbm [shape: bf16[128,128], index: 4, kind: input, shape index: {}]   ;;  %s2427_s5 = inlined_call_operand.vmem [shape: f32[1,128], index: 5, kind: input, shape index: {}]   ;;  %s2428_s6 = inlined_call_operand.vmem [shape: f32[3,128], index: 6, kind: input, shape index: {}]   ;;  %s2429_s7 = inlined_call_operand.hbm [shape: f32[1,8], index: 7, kind: output, shape index: {}]  }
   0x1   :  { %13 = vsyncpa [#allocation6], 0 }
   0x2   :  { %14 = vsyncpa [#allocation9], 0  ;;  %s32_s26 = sshll.u32 %s2423_s1, 4  ;;  %s33_s26 = int_to_ptr.hbm [resolvable:$true] %s32_s26 }
   0x3   :  { %15 = vsyncpa [#allocation4], 0  ;;  %s2343_s27 = smov [#allocation5]   ;;  %s55_s8 = sshll.u32 %s2425_s3, 4  ;;  %s56_s8 = int_to_ptr.hbm [resolvable:$true] %s55_s8 }
   0x4   :  { %s34_s28 = sshll.u32 %s2343_s27, 4  ;;  %s2344_s9 = smov [#allocation8]   ;;  %s35_s28 = int_to_ptr.vmem [resolvable:$true] %s34_s28 }
   0x5   :  { %37 = dma.hbm_to_vmem [thread:$0]  %s33_s26, 1024, %s35_s28, [#allocation6]  }
   0x6   :  { %s57_s10 = sshll.u32 %s2344_s9, 4  ;;  %s21_s13 = sshll.u32 %s2422_s0, 4  ;;  %s58_s10 = int_to_ptr.vmem [resolvable:$true] %s57_s10  ;;  %s22_s13 = int_to_ptr.hbm [resolvable:$true] %s21_s13 }
   0x7   :  { %s2345_s1 = smov 64   ;;  %s2346_s14 = smov 4  }
   0x8   :  { %63 = dma.hbm_to_vmem [thread:$0]  %s56_s8, 8192, %s58_s10, [#allocation9], %s2345_s1, %s2345_s1, %s2346_s14  }
   0x9   :  { %s42_s17 = sshll.u32 %s2424_s2, 4  ;;  %s2347_s18 = smov [#allocation2]   ;;  %s43_s17 = int_to_ptr.hbm [resolvable:$true] %s42_s17 }
   0xa   :  { %s23_s19 = sshll.u32 %s2347_s18, 4  ;;  %s2348_s3 = smov [#allocation7]   ;;  %s24_s19 = int_to_ptr.vmem [resolvable:$true] %s23_s19 }
   0xb   :  { %26 = dma.hbm_to_vmem [thread:$0]  %s22_s13, 1024, %s24_s19, [#allocation3]  }
   0xc   :  { %s44_s20 = sshll.u32 %s2348_s3, 4  ;;  %s68_s0 = sshll.u32 %s2426_s4, 4  ;;  %s45_s20 = int_to_ptr.vmem [resolvable:$true] %s44_s20  ;;  %s69_s0 = int_to_ptr.hbm [resolvable:$true] %s68_s0 }
   0xd   :  { %50 = dma.hbm_to_vmem [thread:$0]  %s43_s17, 8192, %s45_s20, [#allocation6], %s2345_s1, %s2345_s1, %s2346_s14  }
   0xe   :  { %s2349_s23 = smov [#allocation10]  }
   0xf   :  { %s70_s24 = sshll.u32 %s2349_s23, 4  ;;  %s71_s24 = int_to_ptr.vmem [resolvable:$true] %s70_s24 }
  0x10   :  { %76 = dma.hbm_to_vmem [thread:$0]  %s69_s0, 1024, %s71_s24, [#allocation9], %s2345_s1, %s2345_s1, %s2346_s14  }
  0x11   :  { %2335 = dma.done.wait [#allocation3], 1024  }
  0x12   :  { %2336 = vsyncadd [#allocation3], 4294966272 }
  0x13   :  { %2337 = dma.done.wait [#allocation6], 9216  }
  0x14   :  { %2338 = vsyncadd [#allocation6], 4294958080 }
  0x15   :  { %2339 = dma.done.wait [#allocation9], 9216  }
  0x16   :  { %2340 = vsyncadd [#allocation9], 4294958080  ;;  %v2114_v0 = vld [vmem:[#allocation8 + $0x38] sm:$0xff]  ;;  %v2113_v4 = vld [vmem:[#allocation8 + $0x30] sm:$0xff]  ;;  %s2351_s8 = smov [#allocation11]   ;;  %s1487_s12 = sshll.u32 %s2429_s7, 4  ;;  %s1488_s12 = int_to_ptr.hbm [resolvable:$true] %s1487_s12 }
  0x17   :  { %v2122_v1 = vld [vmem:[#allocation8 + $0x78] sm:$0xff]  ;;  %773 = vmatpush.bf16.msra.mxu0 %v2114_v0  ;;  %v2121_v5 = vld [vmem:[#allocation8 + $0x70] sm:$0xff]  ;;  %v2112_v8 = vld [vmem:[#allocation8 + $0x28] sm:$0xff]  ;;  %s1485_s9 = sshll.u32 %s2351_s8, 4  ;;  %vm1478_vm0 = vcmask 57344   ;;  %s1486_s9 = int_to_ptr.vmem [resolvable:$true] %s1485_s9 }
  0x18   :  { %v2130_v2 = vld [vmem:[#allocation8 + $0xb8] sm:$0xff]  ;;  %786 = vmatpush.bf16.msra.mxu1 %v2122_v1  ;;  %v2129_v6 = vld [vmem:[#allocation8 + $0xb0] sm:$0xff]  ;;  %v2120_v9 = vld [vmem:[#allocation8 + $0x68] sm:$0xff] }
  0x19   :  { %v2138_v3 = vld [vmem:[#allocation8 + $0xf8] sm:$0xff]  ;;  %799 = vmatpush.bf16.msra.mxu2 %v2130_v2  ;;  %v2137_v7 = vld [vmem:[#allocation8 + $0xf0] sm:$0xff]  ;;  %v2128_v10 = vld [vmem:[#allocation8 + $0xa8] sm:$0xff] }
  0x1a   :  { %812 = vmatpush.bf16.msra.mxu3 %v2138_v3  ;;  %v2136_v11 = vld [vmem:[#allocation8 + $0xe8] sm:$0xff]  ;;  %v2111_v12 = vld [vmem:[#allocation8 + $0x20] sm:$0xff]  ;;  %v2110_v16 = vld [vmem:[#allocation8 + $0x18] sm:$0xff] }
  0x1b   :  { %774 = vmatpush.bf16.msra.mxu0 %v2113_v4  ;;  %v2119_v13 = vld [vmem:[#allocation8 + $0x60] sm:$0xff]  ;;  %v2118_v17 = vld [vmem:[#allocation8 + $0x58] sm:$0xff]  ;;  %v2109_v20 = vld [vmem:[#allocation8 + $0x10] sm:$0xff] }
  0x1c   :  { %787 = vmatpush.bf16.msra.mxu1 %v2121_v5  ;;  %v2127_v14 = vld [vmem:[#allocation8 + $0xa0] sm:$0xff]  ;;  %v2126_v18 = vld [vmem:[#allocation8 + $0x98] sm:$0xff]  ;;  %v2117_v21 = vld [vmem:[#allocation8 + $0x50] sm:$0xff] }
  0x1d   :  { %800 = vmatpush.bf16.msra.mxu2 %v2129_v6  ;;  %v2135_v15 = vld [vmem:[#allocation8 + $0xe0] sm:$0xff]  ;;  %v2134_v19 = vld [vmem:[#allocation8 + $0xd8] sm:$0xff]  ;;  %v2125_v22 = vld [vmem:[#allocation8 + $0x90] sm:$0xff] }
  0x1e   :  { %813 = vmatpush.bf16.msra.mxu3 %v2137_v7  ;;  %v2133_v23 = vld [vmem:[#allocation8 + $0xd0] sm:$0xff]  ;;  %v2108_v24 = vld [vmem:[#allocation8 + $0x8] sm:$0xff]  ;;  %v2107_v28 = vld [vmem:[#allocation8] sm:$0xff] }
  0x1f   :  { %775 = vmatpush.bf16.msra.mxu0 %v2112_v8  ;;  %v2116_v25 = vld [vmem:[#allocation8 + $0x48] sm:$0xff]  ;;  %v2115_v29 = vld [vmem:[#allocation8 + $0x40] sm:$0xff]  ;;  %v2146_v32 = vld [vmem:[#allocation8 + $0x138] sm:$0xff] }
  0x20   :  { %788 = vmatpush.bf16.msra.mxu1 %v2120_v9  ;;  %v2124_v26 = vld [vmem:[#allocation8 + $0x88] sm:$0xff]  ;;  %v2123_v30 = vld [vmem:[#allocation8 + $0x80] sm:$0xff]  ;;  %v119_v33 = vld [vmem:[#allocation5 + $0x10] sm:$0xff] }
  0x21   :  { %801 = vmatpush.bf16.msra.mxu2 %v2128_v10  ;;  %v2132_v27 = vld [vmem:[#allocation8 + $0xc8] sm:$0xff]  ;;  %v2131_v31 = vld [vmem:[#allocation8 + $0xc0] sm:$0xff]  ;;  %v2154_v35 = vld [vmem:[#allocation8 + $0x178] sm:$0xff]  ;;  %v127_v40 = vpack.c.bf16 %v119_v33, %v119_v33 }
  0x22   :  { %814 = vmatpush.bf16.msra.mxu3 %v2136_v11  ;;  %v117_v34 = vld [vmem:[#allocation5] sm:$0xff]  ;;  %v120_v36 = vld [vmem:[#allocation5 + $0x18] sm:$0xff]  ;;  %v118_v37 = vld [vmem:[#allocation5 + $0x8] sm:$0xff] }
  0x23   :  { %776 = vmatpush.bf16.msra.mxu0 %v2111_v12  ;;  %v2162_v38 = vld [vmem:[#allocation8 + $0x1b8] sm:$0xff]  ;;  %v125_v41 = vpack.c.bf16 %v117_v34, %v117_v34  ;;  %v128_v42 = vpack.c.bf16 %v120_v36, %v120_v36  ;;  %v126_v43 = vpack.c.bf16 %v118_v37, %v118_v37  ;;  %v2145_v44 = vld [vmem:[#allocation8 + $0x130] sm:$0xff]  ;;  %v2144_v48 = vld [vmem:[#allocation8 + $0x128] sm:$0xff] }
  0x24   :  { %789 = vmatpush.bf16.msra.mxu1 %v2119_v13  ;;  %v2170_v39 = vld [vmem:[#allocation8 + $0x1f8] sm:$0xff]  ;;  %v2153_v45 = vld [vmem:[#allocation8 + $0x170] sm:$0xff]  ;;  %v2152_v49 = vld [vmem:[#allocation8 + $0x168] sm:$0xff] }
  0x25   :  { %802 = vmatpush.bf16.msra.mxu2 %v2127_v14  ;;  %v2161_v46 = vld [vmem:[#allocation8 + $0x1b0] sm:$0xff]  ;;  %v2160_v50 = vld [vmem:[#allocation8 + $0x1a8] sm:$0xff]  ;;  %v2143_v52 = vld [vmem:[#allocation8 + $0x120] sm:$0xff] }
  0x26   :  { %815 = vmatpush.bf16.msra.mxu3 %v2135_v15  ;;  %v2169_v47 = vld [vmem:[#allocation8 + $0x1f0] sm:$0xff]  ;;  %v2168_v51 = vld [vmem:[#allocation8 + $0x1e8] sm:$0xff]  ;;  %v2151_v53 = vld [vmem:[#allocation8 + $0x160] sm:$0xff] }
  0x27   :  { %777 = vmatpush.bf16.msra.mxu0 %v2110_v16  ;;  %v2159_v54 = vld [vmem:[#allocation8 + $0x1a0] sm:$0xff]  ;;  %v2142_v56 = vld [vmem:[#allocation8 + $0x118] sm:$0xff]  ;;  %v2141_v60 = vld [vmem:[#allocation8 + $0x110] sm:$0xff] }
  0x28   :  { %790 = vmatpush.bf16.msra.mxu1 %v2118_v17  ;;  %v2167_v55 = vld [vmem:[#allocation8 + $0x1e0] sm:$0xff]  ;;  %v2150_v57 = vld [vmem:[#allocation8 + $0x158] sm:$0xff]  ;;  %v2149_v61 = vld [vmem:[#allocation8 + $0x150] sm:$0xff] }
  0x29   :  { %803 = vmatpush.bf16.msra.mxu2 %v2126_v18  ;;  %v2158_v58 = vld [vmem:[#allocation8 + $0x198] sm:$0xff]  ;;  %v2157_v62 = vld [vmem:[#allocation8 + $0x190] sm:$0xff]  ;;  %v2140_v0 = vld [vmem:[#allocation8 + $0x108] sm:$0xff] }
  0x2a   :  { %816 = vmatpush.bf16.msra.mxu3 %v2134_v19  ;;  %v2166_v59 = vld [vmem:[#allocation8 + $0x1d8] sm:$0xff]  ;;  %v2165_v63 = vld [vmem:[#allocation8 + $0x1d0] sm:$0xff]  ;;  %v2148_v1 = vld [vmem:[#allocation8 + $0x148] sm:$0xff] }
  0x2b   :  { %778 = vmatpush.bf16.msra.mxu0 %v2109_v20  ;;  %v2156_v2 = vld [vmem:[#allocation8 + $0x188] sm:$0xff]  ;;  %v2139_v4 = vld [vmem:[#allocation8 + $0x100] sm:$0xff]  ;;  %v2050_v8 = vld [vmem:[#allocation7 + $0x38] sm:$0xff] }
  0x2c   :  { %791 = vmatpush.bf16.msra.mxu1 %v2117_v21  ;;  %v2164_v3 = vld [vmem:[#allocation8 + $0x1c8] sm:$0xff]  ;;  %v2147_v5 = vld [vmem:[#allocation8 + $0x140] sm:$0xff]  ;;  %v123_v9 = vld [vmem:[#allocation5 + $0x30] sm:$0xff] }
  0x2d   :  { %804 = vmatpush.bf16.msra.mxu2 %v2125_v22  ;;  %v2155_v6 = vld [vmem:[#allocation8 + $0x180] sm:$0xff]  ;;  %v2058_v11 = vld [vmem:[#allocation7 + $0x78] sm:$0xff]  ;;  %v122_v13 = vld [vmem:[#allocation5 + $0x28] sm:$0xff]  ;;  %v131_v16 = vpack.c.bf16 %v123_v9, %v123_v9 }
  0x2e   :  { %817 = vmatpush.bf16.msra.mxu3 %v2133_v23  ;;  %v2163_v7 = vld [vmem:[#allocation8 + $0x1c0] sm:$0xff]  ;;  %v124_v12 = vld [vmem:[#allocation5 + $0x38] sm:$0xff]  ;;  %v130_v19 = vpack.c.bf16 %v122_v13, %v122_v13  ;;  %v2049_v20 = vld [vmem:[#allocation7 + $0x30] sm:$0xff] }
  0x2f   :  { %779 = vmatpush.bf16.msra.mxu0 %v2108_v24  ;;  %v121_v10 = vld [vmem:[#allocation5 + $0x20] sm:$0xff]  ;;  %v2066_v14 = vld [vmem:[#allocation7 + $0xb8] sm:$0xff]  ;;  %v132_v18 = vpack.c.bf16 %v124_v12, %v124_v12  ;;  %v2057_v21 = vld [vmem:[#allocation7 + $0x70] sm:$0xff] }
  0x30   :  { %792 = vmatpush.bf16.msra.mxu1 %v2116_v25  ;;  %v2074_v15 = vld [vmem:[#allocation7 + $0xf8] sm:$0xff]  ;;  %v129_v17 = vpack.c.bf16 %v121_v10, %v121_v10  ;;  %v2065_v22 = vld [vmem:[#allocation7 + $0xb0] sm:$0xff]  ;;  %v2048_v24 = vld [vmem:[#allocation7 + $0x28] sm:$0xff] }
  0x31   :  { %805 = vmatpush.bf16.msra.mxu2 %v2124_v26  ;;  %v2073_v23 = vld [vmem:[#allocation7 + $0xf0] sm:$0xff]  ;;  %v2056_v25 = vld [vmem:[#allocation7 + $0x68] sm:$0xff]  ;;  %v2054_v33 = vld [vmem:[#allocation7 + $0x58] sm:$0xff] }
  0x32   :  { %818 = vmatpush.bf16.msra.mxu3 %v2132_v27  ;;  %v2064_v26 = vld [vmem:[#allocation7 + $0xa8] sm:$0xff]  ;;  %v2062_v34 = vld [vmem:[#allocation7 + $0x98] sm:$0xff]  ;;  %v2045_v36 = vld [vmem:[#allocation7 + $0x10] sm:$0xff] }
  0x33   :  { %780 = vmatpush.bf16.msra.mxu0 %v2107_v28  ;;  %v2072_v27 = vld [vmem:[#allocation7 + $0xe8] sm:$0xff]  ;;  %v2047_v28 = vld [vmem:[#allocation7 + $0x20] sm:$0xff]  ;;  %v2053_v37 = vld [vmem:[#allocation7 + $0x50] sm:$0xff] }
  0x34   :  { %793 = vmatpush.bf16.msra.mxu1 %v2115_v29  ;;  %v2055_v29 = vld [vmem:[#allocation7 + $0x60] sm:$0xff]  ;;  %v2086_v9 = vld [vmem:[#allocation7 + $0x158] sm:$0xff]  ;;  %v2077_v12 = vld [vmem:[#allocation7 + $0x110] sm:$0xff] }
  0x35   :  { %806 = vmatpush.bf16.msra.mxu2 %v2123_v30  ;;  %v2063_v30 = vld [vmem:[#allocation7 + $0xa0] sm:$0xff]  ;;  %v2094_v10 = vld [vmem:[#allocation7 + $0x198] sm:$0xff]  ;;  %v2085_v13 = vld [vmem:[#allocation7 + $0x150] sm:$0xff] }
  0x36   :  { %819 = vmatpush.bf16.msra.mxu3 %v2131_v31  ;;  %781 = vmatmul.bf16.vlgmr.msra.gmra.mxu0 %v125_v41  ;;  %v2071_v31 = vld [vmem:[#allocation7 + $0xe0] sm:$0xff]  ;;  %v2052_v41 = vld [vmem:[#allocation7 + $0x48] sm:$0xff] }
  0x37   :  { %825 = vmatpush.bf16.msrb.mxu0 %v2146_v32  ;;  %794 = vmatmul.bf16.vlgmr.msra.gmra.mxu1 %v126_v43  ;;  %v2046_v32 = vld [vmem:[#allocation7 + $0x18] sm:$0xff]  ;;  %v2068_v43 = vld [vmem:[#allocation7 + $0xc8] sm:$0xff] }
  0x38   :  { %838 = vmatpush.bf16.msrb.mxu1 %v2154_v35  ;;  %807 = vmatmul.bf16.vlgmr.msra.gmra.mxu2 %v127_v40  ;;  %v2070_v35 = vld [vmem:[#allocation7 + $0xd8] sm:$0xff]  ;;  %v2044_v40 = vld [vmem:[#allocation7 + $0x8] sm:$0xff] }
  0x39   :  { %851 = vmatpush.bf16.msrb.mxu2 %v2162_v38  ;;  %820 = vmatmul.bf16.vlgmr.msra.gmra.mxu3 %v128_v42  ;;  %v2061_v38 = vld [vmem:[#allocation7 + $0x90] sm:$0xff]  ;;  %v2060_v42 = vld [vmem:[#allocation7 + $0x88] sm:$0xff] }
  0x3a   :  { %864 = vmatpush.bf16.msrb.mxu3 %v2170_v39  ;;  %v2069_v39 = vld [vmem:[#allocation7 + $0xd0] sm:$0xff] }
  0x3b   :  { %826 = vmatpush.bf16.msrb.mxu0 %v2145_v44  ;;  %v2043_v44 = vld [vmem:[#allocation7] sm:$0xff] }
  0x3c   :  { %839 = vmatpush.bf16.msrb.mxu1 %v2153_v45  ;;  %v2051_v45 = vld [vmem:[#allocation7 + $0x40] sm:$0xff] }
  0x3d   :  { %852 = vmatpush.bf16.msrb.mxu2 %v2161_v46  ;;  %v2059_v46 = vld [vmem:[#allocation7 + $0x80] sm:$0xff] }
  0x3e   :  { %865 = vmatpush.bf16.msrb.mxu3 %v2169_v47  ;;  %v2067_v47 = vld [vmem:[#allocation7 + $0xc0] sm:$0xff] }
  0x3f   :  { %827 = vmatpush.bf16.msrb.mxu0 %v2144_v48  ;;  %v2082_v48 = vld [vmem:[#allocation7 + $0x138] sm:$0xff] }
  0x40   :  { %840 = vmatpush.bf16.msrb.mxu1 %v2152_v49  ;;  %v101_v49 = vld [vmem:[#allocation2] sm:$0xff] }
  0x41   :  { %853 = vmatpush.bf16.msrb.mxu2 %v2160_v50  ;;  %v103_v50 = vld [vmem:[#allocation2 + $0x10] sm:$0xff] }
  0x42   :  { %866 = vmatpush.bf16.msrb.mxu3 %v2168_v51  ;;  %v2090_v51 = vld [vmem:[#allocation7 + $0x178] sm:$0xff] }
  0x43   :  { %828 = vmatpush.bf16.msrb.mxu0 %v2143_v52  ;;  %v102_v52 = vld [vmem:[#allocation2 + $0x8] sm:$0xff] }
  0x44   :  { %841 = vmatpush.bf16.msrb.mxu1 %v2151_v53  ;;  %v104_v53 = vld [vmem:[#allocation2 + $0x18] sm:$0xff] }
  0x45   :  { %854 = vmatpush.bf16.msrb.mxu2 %v2159_v54  ;;  %v2098_v54 = vld [vmem:[#allocation7 + $0x1b8] sm:$0xff] }
  0x46   :  { %867 = vmatpush.bf16.msrb.mxu3 %v2167_v55  ;;  %v2106_v55 = vld [vmem:[#allocation7 + $0x1f8] sm:$0xff] }
  0x47   :  { %829 = vmatpush.bf16.msrb.mxu0 %v2142_v56  ;;  %v109_v56 = vpack.c.bf16 %v101_v49, %v101_v49 }
  0x48   :  { %842 = vmatpush.bf16.msrb.mxu1 %v2150_v57  ;;  %v111_v57 = vpack.c.bf16 %v103_v50, %v103_v50  ;;  %v2177_v50 = vld [vmem:[#allocation10 + $0x30] sm:$0xff] }
  0x49   :  { %855 = vmatpush.bf16.msrb.mxu2 %v2158_v58  ;;  %v110_v58 = vpack.c.bf16 %v102_v52, %v102_v52  ;;  %v2176_v52 = vld [vmem:[#allocation10 + $0x28] sm:$0xff] }
  0x4a   :  { %868 = vmatpush.bf16.msrb.mxu3 %v2166_v59  ;;  %v112_v59 = vpack.c.bf16 %v104_v53, %v104_v53 }
  0x4b   :  { %830 = vmatpush.bf16.msrb.mxu0 %v2141_v60  ;;  %v2081_v60 = vld [vmem:[#allocation7 + $0x130] sm:$0xff] }
  0x4c   :  { %843 = vmatpush.bf16.msrb.mxu1 %v2149_v61  ;;  %v2089_v61 = vld [vmem:[#allocation7 + $0x170] sm:$0xff] }
  0x4d   :  { %856 = vmatpush.bf16.msrb.mxu2 %v2157_v62  ;;  %v2097_v62 = vld [vmem:[#allocation7 + $0x1b0] sm:$0xff] }
  0x4e   :  { %869 = vmatpush.bf16.msrb.mxu3 %v2165_v63  ;;  %v2105_v63 = vld [vmem:[#allocation7 + $0x1f0] sm:$0xff] }
  0x4f   :  { %831 = vmatpush.bf16.msrb.mxu0 %v2140_v0  ;;  %v2080_v0 = vld [vmem:[#allocation7 + $0x128] sm:$0xff] }
  0x50   :  { %844 = vmatpush.bf16.msrb.mxu1 %v2148_v1  ;;  %v2088_v1 = vld [vmem:[#allocation7 + $0x168] sm:$0xff] }
  0x51   :  { %857 = vmatpush.bf16.msrb.mxu2 %v2156_v2  ;;  %v2096_v2 = vld [vmem:[#allocation7 + $0x1a8] sm:$0xff] }
  0x52   :  { %870 = vmatpush.bf16.msrb.mxu3 %v2164_v3  ;;  %v2104_v3 = vld [vmem:[#allocation7 + $0x1e8] sm:$0xff] }
  0x53   :  { %832 = vmatpush.bf16.msrb.mxu0 %v2139_v4  ;;  %v2079_v4 = vld [vmem:[#allocation7 + $0x120] sm:$0xff] }
  0x54   :  { %845 = vmatpush.bf16.msrb.mxu1 %v2147_v5  ;;  %v2087_v5 = vld [vmem:[#allocation7 + $0x160] sm:$0xff] }
  0x55   :  { %858 = vmatpush.bf16.msrb.mxu2 %v2155_v6  ;;  %v2095_v6 = vld [vmem:[#allocation7 + $0x1a0] sm:$0xff] }
  0x56   :  { %871 = vmatpush.bf16.msrb.mxu3 %v2163_v7  ;;  %833 = vmatmul.bf16.vlgmr.msrb.gmra.mxu0 %v129_v17  ;;  %v2103_v7 = vld [vmem:[#allocation7 + $0x1e0] sm:$0xff]  ;;  %v2084_v17 = vld [vmem:[#allocation7 + $0x148] sm:$0xff] }
  0x57   :  { %1261 = vmatpush.bf16.msra.mxu0 %v2050_v8  ;;  %846 = vmatmul.bf16.vlgmr.msrb.gmra.mxu1 %v130_v19  ;;  %v2078_v8 = vld [vmem:[#allocation7 + $0x118] sm:$0xff]  ;;  %v2100_v19 = vld [vmem:[#allocation7 + $0x1c8] sm:$0xff] }
  0x58   :  { %1274 = vmatpush.bf16.msra.mxu1 %v2058_v11  ;;  %859 = vmatmul.bf16.vlgmr.msrb.gmra.mxu2 %v131_v16  ;;  %v2102_v11 = vld [vmem:[#allocation7 + $0x1d8] sm:$0xff]  ;;  %v2076_v16 = vld [vmem:[#allocation7 + $0x108] sm:$0xff] }
  0x59   :  { %1287 = vmatpush.bf16.msra.mxu2 %v2066_v14  ;;  %872 = vmatmul.bf16.vlgmr.msrb.gmra.mxu3 %v132_v18  ;;  %v2093_v14 = vld [vmem:[#allocation7 + $0x190] sm:$0xff]  ;;  %v2092_v18 = vld [vmem:[#allocation7 + $0x188] sm:$0xff] }
  0x5a   :  { %1300 = vmatpush.bf16.msra.mxu3 %v2074_v15  ;;  %v2101_v15 = vld [vmem:[#allocation7 + $0x1d0] sm:$0xff] }
  0x5b   :  { %1262 = vmatpush.bf16.msra.mxu0 %v2049_v20  ;;  %v2075_v20 = vld [vmem:[#allocation7 + $0x100] sm:$0xff] }
  0x5c   :  { %1275 = vmatpush.bf16.msra.mxu1 %v2057_v21  ;;  %v2083_v21 = vld [vmem:[#allocation7 + $0x140] sm:$0xff] }
  0x5d   :  { %1288 = vmatpush.bf16.msra.mxu2 %v2065_v22  ;;  %v2091_v22 = vld [vmem:[#allocation7 + $0x180] sm:$0xff] }
  0x5e   :  { %1301 = vmatpush.bf16.msra.mxu3 %v2073_v23  ;;  %v105_v23 = vld [vmem:[#allocation2 + $0x20] sm:$0xff] }
  0x5f   :  { %1263 = vmatpush.bf16.msra.mxu0 %v2048_v24  ;;  %v106_v24 = vld [vmem:[#allocation2 + $0x28] sm:$0xff] }
  0x60   :  { %1276 = vmatpush.bf16.msra.mxu1 %v2056_v25  ;;  %v2099_v25 = vld [vmem:[#allocation7 + $0x1c0] sm:$0xff] }
  0x61   :  { %1289 = vmatpush.bf16.msra.mxu2 %v2064_v26  ;;  %v107_v26 = vld [vmem:[#allocation2 + $0x30] sm:$0xff] }
  0x62   :  { %1302 = vmatpush.bf16.msra.mxu3 %v2072_v27  ;;  %v108_v27 = vld [vmem:[#allocation2 + $0x38] sm:$0xff] }
  0x63   :  { %1264 = vmatpush.bf16.msra.mxu0 %v2047_v28  ;;  %v113_v28 = vpack.c.bf16 %v105_v23, %v105_v23 }
  0x64   :  { %1277 = vmatpush.bf16.msra.mxu1 %v2055_v29  ;;  %v114_v29 = vpack.c.bf16 %v106_v24, %v106_v24 }
  0x65   :  { %1290 = vmatpush.bf16.msra.mxu2 %v2063_v30  ;;  %v115_v30 = vpack.c.bf16 %v107_v26, %v107_v26 }
  0x66   :  { %1303 = vmatpush.bf16.msra.mxu3 %v2071_v31  ;;  %v116_v31 = vpack.c.bf16 %v108_v27, %v108_v27  ;;  %v1451_v27 = vld [vmem:[%s2428_s6 + $0x2] sm:$0x1] }
  0x67   :  { %1265 = vmatpush.bf16.msra.mxu0 %v2046_v32 }
  0x68   :  { %1278 = vmatpush.bf16.msra.mxu1 %v2054_v33 }
  0x69   :  { %1291 = vmatpush.bf16.msra.mxu2 %v2062_v34 }
  0x6a   :  { %1304 = vmatpush.bf16.msra.mxu3 %v2070_v35 }
  0x6b   :  { %1266 = vmatpush.bf16.msra.mxu0 %v2045_v36 }
  0x6c   :  { %1279 = vmatpush.bf16.msra.mxu1 %v2053_v37 }
  0x6d   :  { %1292 = vmatpush.bf16.msra.mxu2 %v2061_v38 }
  0x6e   :  { %1305 = vmatpush.bf16.msra.mxu3 %v2069_v39 }
  0x6f   :  { %1267 = vmatpush.bf16.msra.mxu0 %v2044_v40 }
  0x70   :  { %1280 = vmatpush.bf16.msra.mxu1 %v2052_v41 }
  0x71   :  { %1293 = vmatpush.bf16.msra.mxu2 %v2060_v42 }
  0x72   :  { %1306 = vmatpush.bf16.msra.mxu3 %v2068_v43 }
  0x73   :  { %1268 = vmatpush.bf16.msra.mxu0 %v2043_v44 }
  0x74   :  { %1281 = vmatpush.bf16.msra.mxu1 %v2051_v45 }
  0x75   :  { %1294 = vmatpush.bf16.msra.mxu2 %v2059_v46 }
  0x76   :  { %1307 = vmatpush.bf16.msra.mxu3 %v2067_v47  ;;  %1269 = vmatmul.bf16.vlgmr.msra.gmra.mxu0 %v109_v56  ;;  %v2178_v47 = vld [vmem:[#allocation10 + $0x38] sm:$0xff] }
  0x77   :  { %1313 = vmatpush.bf16.msrb.mxu0 %v2082_v48  ;;  %1282 = vmatmul.bf16.vlgmr.msra.gmra.mxu1 %v110_v58  ;;  %v2173_v58 = vld [vmem:[#allocation10 + $0x10] sm:$0xff] }
  0x78   :  { %1326 = vmatpush.bf16.msrb.mxu1 %v2090_v51  ;;  %1295 = vmatmul.bf16.vlgmr.msra.gmra.mxu2 %v111_v57 }
  0x79   :  { %1339 = vmatpush.bf16.msrb.mxu2 %v2098_v54  ;;  %1308 = vmatmul.bf16.vlgmr.msra.gmra.mxu3 %v112_v59  ;;  %v2175_v54 = vld [vmem:[#allocation10 + $0x20] sm:$0xff] }
  0x7a   :  { %1352 = vmatpush.bf16.msrb.mxu3 %v2106_v55  ;;  %v2174_v55 = vld [vmem:[#allocation10 + $0x18] sm:$0xff] }
  0x7b   :  { %1314 = vmatpush.bf16.msrb.mxu0 %v2081_v60 }
  0x7c   :  { %1327 = vmatpush.bf16.msrb.mxu1 %v2089_v61  ;;  %v2172_v61 = vld [vmem:[#allocation10 + $0x8] sm:$0xff] }
  0x7d   :  { %1340 = vmatpush.bf16.msrb.mxu2 %v2097_v62 }
  0x7e   :  { %1353 = vmatpush.bf16.msrb.mxu3 %v2105_v63 }
  0x7f   :  { %1315 = vmatpush.bf16.msrb.mxu0 %v2080_v0 }
  0x80   :  { %1328 = vmatpush.bf16.msrb.mxu1 %v2088_v1 }
  0x81   :  { %1341 = vmatpush.bf16.msrb.mxu2 %v2096_v2  ;;  %v2171_v2 = vld [vmem:[#allocation10] sm:$0xff] }
  0x82   :  { %1354 = vmatpush.bf16.msrb.mxu3 %v2104_v3 }
  0x83   :  { %1316 = vmatpush.bf16.msrb.mxu0 %v2079_v4 }
  0x84   :  { %1329 = vmatpush.bf16.msrb.mxu1 %v2087_v5 }
  0x85   :  { %1342 = vmatpush.bf16.msrb.mxu2 %v2095_v6 }
  0x86   :  { %1355 = vmatpush.bf16.msrb.mxu3 %v2103_v7 }
  0x87   :  { %1317 = vmatpush.bf16.msrb.mxu0 %v2078_v8 }
  0x88   :  { %1330 = vmatpush.bf16.msrb.mxu1 %v2086_v9 }
  0x89   :  { %1343 = vmatpush.bf16.msrb.mxu2 %v2094_v10 }
  0x8a   :  { %1356 = vmatpush.bf16.msrb.mxu3 %v2102_v11 }
  0x8b   :  { %1318 = vmatpush.bf16.msrb.mxu0 %v2077_v12 }
  0x8c   :  { %1331 = vmatpush.bf16.msrb.mxu1 %v2085_v13 }
  0x8d   :  { %1344 = vmatpush.bf16.msrb.mxu2 %v2093_v14 }
  0x8e   :  { %1357 = vmatpush.bf16.msrb.mxu3 %v2101_v15 }
  0x8f   :  { %1319 = vmatpush.bf16.msrb.mxu0 %v2076_v16 }
  0x90   :  { %1332 = vmatpush.bf16.msrb.mxu1 %v2084_v17 }
  0x91   :  { %1345 = vmatpush.bf16.msrb.mxu2 %v2092_v18  ;;  %v2189_v18 = vld [vmem:[%s2428_s6] ss:$0 sm:$0xff] }
  0x92   :  { %1358 = vmatpush.bf16.msrb.mxu3 %v2100_v19 }
  0x93   :  { %1320 = vmatpush.bf16.msrb.mxu0 %v2075_v20 }
  0x94   :  { %1333 = vmatpush.bf16.msrb.mxu1 %v2083_v21 }
  0x95   :  { %1346 = vmatpush.bf16.msrb.mxu2 %v2091_v22 }
  0x96   :  { %1359 = vmatpush.bf16.msrb.mxu3 %v2099_v25  ;;  %1321 = vmatmul.bf16.vlgmr.msrb.gmra.mxu0 %v113_v28  ;;  %v2350_v28 = vmov 0  }
  0x97   :  { %1334 = vmatmul.bf16.vlgmr.msrb.gmra.mxu1 %v114_v29  ;;  %1436 = vmatpush.bf16.msra.mxu0 %v2178_v47  ;;  %v2190_v29 = vld [vmem:[%s2428_s6 + $0x1] ss:$0 sm:$0xff] }
  0x98   :  { %1347 = vmatmul.bf16.vlgmr.msrb.gmra.mxu2 %v115_v30  ;;  %2188 = vset.pattern.permute.xlu0 %v2350_v28 }
  0x99   :  { %1360 = vmatmul.bf16.vlgmr.msrb.gmra.mxu3 %v116_v31  ;;  %1454 = vperm.xlu0 %2188, %v1451_v27  }
  0x9b   :  { %1437 = vmatpush.bf16.msra.mxu0 %v2177_v50 }
  0x9f   :  { %1438 = vmatpush.bf16.msra.mxu0 %v2176_v52 }
  0xa3   :  { %1439 = vmatpush.bf16.msra.mxu0 %v2175_v54 }
  0xa7   :  { %1440 = vmatpush.bf16.msra.mxu0 %v2174_v55 }
  0xab   :  { %1441 = vmatpush.bf16.msra.mxu0 %v2173_v58 }
  0xaf   :  { %1442 = vmatpush.bf16.msra.mxu0 %v2172_v61 }
  0xb3   :  { %v782_v32 = vpop.f32.mrf.mxu0  ;;  %1443 = vmatpush.bf16.msra.mxu0 %v2171_v2 }
  0xb4   :  { %v795_v33 = vpop.f32.mrf.mxu1 }
  0xb5   :  { %v796_v34 = vadd.f32 %v795_v33, %v782_v32  ;;  %v1450_v33 = vld [vmem:[%s2427_s5] sm:$0x1] }
  0xbb   :  { %v808_v35 = vpop.f32.mrf.mxu2  ;;  %v784_v38 = vpop.f32.mrf.mxu0 }
  0xbc   :  { %v809_v36 = vadd.f32 %v808_v35, %v796_v34  ;;  %v821_v37 = vpop.f32.mrf.mxu3  ;;  %v797_v40 = vpop.f32.mrf.mxu1 }
  0xbe   :  { %v822_v39 = vadd.f32 %v821_v37, %v809_v36 }
  0xc3   :  { %v810_v41 = vpop.f32.mrf.mxu2 }
  0xc4   :  { %v823_v42 = vpop.f32.mrf.mxu3 }
  0xd3   :  { %v834_v43 = vpop.f32.mrf.mxu0 }
  0xd4   :  { %v847_v44 = vpop.f32.mrf.mxu1  ;;  %v835_v59 = vadd.f32 %v834_v43, %v822_v39 }
  0xd6   :  { %v848_v0 = vadd.f32 %v847_v44, %v835_v59 }
  0xdb   :  { %v860_v45 = vpop.f32.mrf.mxu2  ;;  %v836_v48 = vpop.f32.mrf.mxu0 }
  0xdc   :  { %v873_v46 = vpop.f32.mrf.mxu3  ;;  %v849_v49 = vpop.f32.mrf.mxu1  ;;  %v861_v3 = vadd.f32 %v860_v45, %v848_v0 }
  0xde   :  { %v874_v6 = vadd.f32 %v873_v46, %v861_v3 }
  0xe3   :  { %v862_v51 = vpop.f32.mrf.mxu2 }
  0xe4   :  { %v875_v53 = vpop.f32.mrf.mxu3 }
  0xf3   :  { %v1270_v56 = vpop.f32.mrf.mxu0 }
  0xf4   :  { %v1283_v57 = vpop.f32.mrf.mxu1  ;;  %v1271_v7 = vadd.f32 %v1270_v56, %v874_v6 }
  0xf6   :  { %v1284_v8 = vadd.f32 %v1283_v57, %v1271_v7 }
  0xfb   :  { %v1296_v60 = vpop.f32.mrf.mxu2  ;;  %v1272_v63 = vpop.f32.mrf.mxu0 }
  0xfc   :  { %v1309_v62 = vpop.f32.mrf.mxu3  ;;  %v1285_v1 = vpop.f32.mrf.mxu1  ;;  %v1297_v9 = vadd.f32 %v1296_v60, %v1284_v8 }
  0xfe   :  { %v1310_v10 = vadd.f32 %v1309_v62, %v1297_v9 }
 0x103   :  { %v1298_v4 = vpop.f32.mrf.mxu2 }
 0x104   :  { %v1311_v5 = vpop.f32.mrf.mxu3 }
 0x10b   :  { %v1455_v35 = vpop.permute.xlu0 %1454 }
 0x113   :  { %v1322_v11 = vpop.f32.mrf.mxu0 }
 0x114   :  { %v1335_v12 = vpop.f32.mrf.mxu1  ;;  %v1323_v13 = vadd.f32 %v1322_v11, %v1310_v10 }
 0x116   :  { %v1336_v14 = vadd.f32 %v1335_v12, %v1323_v13 }
 0x11b   :  { %v1348_v15 = vpop.f32.mrf.mxu2  ;;  %v1324_v19 = vpop.f32.mrf.mxu0 }
 0x11c   :  { %v1361_v16 = vpop.f32.mrf.mxu3  ;;  %v1349_v17 = vadd.f32 %v1348_v15, %v1336_v14  ;;  %v1337_v20 = vpop.f32.mrf.mxu1 }
 0x11e   :  { %v1362_v21 = vadd.f32 %v1361_v16, %v1349_v17 }
 0x120   :  { %v1367_v22 = vadd.f32 %v2189_v18, %v1362_v21 }
 0x122   :  { %v1368_v23 = vmax.f32 %v1367_v22, 0.0 }
 0x123   :  { %v1350_v24 = vpop.f32.mrf.mxu2 }
 0x124   :  { %v1363_v25 = vpop.f32.mrf.mxu3  ;;  %v1369_v26 = vpack.c.bf16 %v1368_v23, %v1368_v23 }
 0x126   :  { %1444 = vmatmul.bf16.vlgmr.msra.gmra.mxu0 %v1369_v26 }
 0x1a3   :  { %v1445_v30 = vpop.f32.mrf.mxu0 }
 0x1a4   :  { %v1446_v31 = vadd.f32 %v2190_v29, %v1445_v30 }
 0x1a6   :  { %v1449_v32 = vmax.f32 %v1446_v31, 0.0 }
 0x1a8   :  { %1472 = vmatpush.xpose.msra.mxu1 %v1449_v32 }
 0x1ab   :  { %v1447_v34 = vpop.f32.mrf.mxu0  ;;  %1473 = vmatmul.f32.vlgmr.msra.gmra.mxu1 %v1450_v33 }
 0x228   :  { %v1474_v36 = vpop.f32.mrf.mxu1 }
 0x229   :  { %v1475_v37 = vadd.f32 %v1474_v36, %v1455_v35 }
 0x22b   :  { %v1477_v38 = vmax.f32 %v1475_v37, 0.0 }
 0x22d   :  { %1479 = vst.msk [vmem:[#allocation11] sm:$0x1] %vm1478_vm0, %v1477_v38 }
 0x22e   :  { %1490 = dma.vmem_to_hbm [thread:$0]  %s1486_s9, 16, %s1488_s12, [#allocation4]  }
 0x22f   :  { %2341 = dma.done.wait [#allocation4], 16  }
 0x230   :  { %2342 = vsyncadd [#allocation4], 4294967280 }
 0x231   :  { %1495 = vsyncpa [#allocation3], 1 }
 0x232   :  { %1496 = vsyncpa [#allocation6], 1 }
 0x233   :  { %1497 = vsyncpa [#allocation9], 1 }
 0x234   :  { %1498 = vsyncpa [#allocation4], 1 }

</bundles_post_ra>
